<compile_context>
chip_gen: v7x
topology: tpu7x:2x2x1
jax: 0.10.0
libtpu: 0.0.40
codegen_flags: <defaults>
</compile_context>

<pallas_src>
import functools
import math

import jax
import jax.numpy as jnp
import numpy as np
from jax import lax
from jax.experimental import pallas as pl
from jax.experimental.pallas import tpu as pltpu

# Sobel taps (same constants the nn.Module builds in __init__) -- used by the
# pure-JAX reference only; the kernel uses the separable factorization.
SOBEL_X = np.array([[1.0, 0.0, -1.0],
                    [2.0, 0.0, -2.0],
                    [1.0, 0.0, -1.0]], dtype=np.float32)
SOBEL_Y = np.array([[1.0, 2.0, 1.0],
                    [0.0, 0.0, 0.0],
                    [-1.0, -2.0, -1.0]], dtype=np.float32)

_TARGET_BLOCK_BYTES = 1 << 20  # ~1 MiB of payload per input per grid step


def _boundary_loss_kernel(x_ref, t_ref, out_ref, *, img_h, total_rows, mask_tail):
    """x_ref, t_ref: (TB*H, W) blocks (TB whole images, rows flattened).
       out_ref: (1, 1) SMEM slot -> this program's partial sum."""
    tbh, w = x_ref.shape                      # static block dims
    x = x_ref[...].astype(jnp.float32)        # upcast (bf16 inputs allowed)
    t = t_ref[...].astype(jnp.float32)

    # Row index within each image, shape (TB*H, 1).  Computed with exact f32
    # math (tbh < 2**24), and compared against half-integer thresholds so tiny
    # rounding can never misclassify a row.
    h = float(img_h)
    r = lax.broadcasted_iota(jnp.int32, (tbh, 1), 0).astype(jnp.float32)
    rin = r - jnp.floor(r / h) * h
    top = rin < 0.5                           # first row of an image
    bot = rin > (h - 1.5)                     # last row of an image

    c = lax.broadcasted_iota(jnp.int32, (1, w), 1)
    left = c == 0
    right = c == (w - 1)

    # Zero-padded neighbor rows via lane/sublane rotations (XLU) + masks.
    # roll(x, s, axis): out[i] = x[(i - s) % size]  (jnp.roll semantics).
    x_up = jnp.where(top, 0.0, pltpu.roll(x, 1, 0))          # x[r-1, c]
    x_dn = jnp.where(bot, 0.0, pltpu.roll(x, tbh - 1, 0))    # x[r+1, c]

    # Separable Sobel: vertical passes first.
    v = x_up + 2.0 * x + x_dn                 # [1, 2, 1] along rows
    d = x_up - x_dn                           # [1, 0, -1] along rows

    # Horizontal passes (zero-padded neighbor columns).
    v_l = jnp.where(left, 0.0, pltpu.roll(v, 1, 1))          # v[r, c-1]
    v_r = jnp.where(right, 0.0, pltpu.roll(v, w - 1, 1))     # v[r, c+1]
    d_l = jnp.where(left, 0.0, pltpu.roll(d, 1, 1))
    d_r = jnp.where(right, 0.0, pltpu.roll(d, w - 1, 1))

    gx = v_l - v_r                            # conv2d(x, sobel_x, padding=1)
    gy = d_l + 2.0 * d + d_r                  # conv2d(x, sobel_y, padding=1)

    wg = (jnp.abs(gx) + jnp.abs(gy)) * (1.0 - t)

    if mask_tail:
        # Last block may extend past the array; zero the garbage rows.
        ri = lax.broadcasted_iota(jnp.int32, (tbh, 1), 0)
        n_valid = total_rows - pl.program_id(0) * tbh
        wg = jnp.where(ri < n_valid, wg, 0.0)

    out_ref[0, 0] = jnp.sum(wg)               # one partial sum per program


@functools.partial(jax.jit, static_argnames=("target_block_bytes",))
def boundary_loss(probability_map, target, *,
                  target_block_bytes=_TARGET_BLOCK_BYTES):
    """probability_map, target: (N, 1, H, W) -> scalar f32 loss (mean)."""
    N, C, H, W = probability_map.shape
    if C != 1:
        raise ValueError("Sobel filters are single-channel: expected C == 1")

    total_rows = N * H
    x2 = probability_map.reshape(total_rows, W)   # free reshape (metadata only)
    t2 = target.reshape(total_rows, W)

    # Whole images per block (so the halo never crosses a block boundary);
    # keep the block's sublane extent (TB*H) a multiple of 8, or cover all rows.
    itemsize = max(x2.dtype.itemsize, t2.dtype.itemsize)
    tb = max(1, int(target_block_bytes) // (H * W * itemsize))
    if tb >= N:
        tb = N
    else:
        m = 8 // math.gcd(H, 8)
        tb = max(m, (tb // m) * m)
        if tb >= N:
            tb = N
    tbh = tb * H
    grid = pl.cdiv(N, tb)
    mask_tail = (grid * tb != N)

    # 2 inputs x 2 pipeline buffers + ~6-8 live block-sized f32 temporaries.
    blk_in_bytes = tbh * W * (x2.dtype.itemsize + t2.dtype.itemsize)
    blk_f32_bytes = tbh * W * 4
    vmem_limit = 2 * 2 * blk_in_bytes + 8 * blk_f32_bytes + (2 << 20)
    vmem_limit = int(min(max(vmem_limit, 32 << 20), 48 << 20))  # v7x-safe cap

    kernel = functools.partial(_boundary_loss_kernel, img_h=H,
                               total_rows=total_rows, mask_tail=mask_tail)

    partials = pl.pallas_call(
        kernel,
        out_shape=jax.ShapeDtypeStruct((grid, 1), jnp.float32),
        grid_spec=pltpu.PrefetchScalarGridSpec(
            num_scalar_prefetch=0,
            grid=(grid,),
            in_specs=[
                pl.BlockSpec((tbh, W), lambda b: (b, 0)),
                pl.BlockSpec((tbh, W), lambda b: (b, 0)),
            ],
            out_specs=pl.BlockSpec((1, 1), lambda b: (b, 0),
                                   memory_space=pltpu.SMEM),
        ),
        compiler_params=pltpu.CompilerParams(
            dimension_semantics=("parallel",),   # no cross-step state -> both TCs
            vmem_limit_bytes=vmem_limit,
        ),
    )(x2, t2)

    return jnp.sum(partials) / (N * C * H * W)


def _reference_boundary_loss(probability_map, target):
    """Pure-JAX reference using lax conv (NCHW, padding=1)."""
    wx = jnp.asarray(SOBEL_X).reshape(1, 1, 3, 3)
    wy = jnp.asarray(SOBEL_Y).reshape(1, 1, 3, 3)
    dn = jax.lax.conv_dimension_numbers(probability_map.shape, wx.shape,
                                        ("NCHW", "OIHW", "NCHW"))
    gx = jax.lax.conv_general_dilated(probability_map, wx, (1, 1),
                                      [(1, 1), (1, 1)], dimension_numbers=dn)
    gy = jax.lax.conv_general_dilated(probability_map, wy, (1, 1),
                                      [(1, 1), (1, 1)], dimension_numbers=dn)
    gradient = jnp.abs(gx) + jnp.abs(gy)
    return jnp.mean(gradient * (1.0 - target))


if __name__ == "__main__":
    key = jax.random.PRNGKey(0)
    k1, k2 = jax.random.split(key)

    # Case 1: small, module-consistent shapes (C must be 1 for the (1,1,3,3) Sobel).
    N, C, H, W = 3, 1, 16, 128
    prob = jax.nn.sigmoid(jax.random.normal(k1, (N, C, H, W), dtype=jnp.float32))
    tgt = (jax.random.uniform(k2, (N, C, H, W)) > 0.5).astype(jnp.float32)

    loss = jax.block_until_ready(boundary_loss(prob, tgt))
    ref = jax.block_until_ready(_reference_boundary_loss(prob, tgt))
    assert np.allclose(np.asarray(loss), np.asarray(ref),
                       rtol=1e-5, atol=1e-5), (loss, ref)

    # Case 2: force several grid steps plus a ragged tail block
    # (5 images, 2 images per block -> 3 programs, last one half empty).
    k3, k4 = jax.random.split(k2)
    N2 = 5
    prob2 = jax.nn.sigmoid(jax.random.normal(k3, (N2, C, H, W), dtype=jnp.float32))
    tgt2 = (jax.random.uniform(k4, (N2, C, H, W)) > 0.5).astype(jnp.float32)

    loss2 = jax.block_until_ready(
        boundary_loss(prob2, tgt2, target_block_bytes=2 * H * W * 4))
    ref2 = jax.block_until_ready(_reference_boundary_loss(prob2, tgt2))
    assert np.allclose(np.asarray(loss2), np.asarray(ref2),
                       rtol=1e-5, atol=1e-5), (loss2, ref2)

    print("KERNEL_OK")
</pallas_src>

<mosaic_0001>
module attributes {stable_mosaic.version = 11 : i64} {
  func.func @_boundary_loss_kernel(%arg0: i32, %arg1: memref<48x128xf32, #tpu.memory_space<vmem>>, %arg2: memref<48x128xf32, #tpu.memory_space<vmem>>, %arg3: memref<1x1xf32, #tpu.memory_space<smem>>) attributes {dimension_semantics = [#tpu.dimension_semantics<parallel>], iteration_bounds = array<i64: 1>, scalar_prefetch = 0 : i64, scratch_operands = 0 : i64, tpu.core_type = #tpu.core_type<tc>, window_params = [{transform_indices = @transform_0, window_bounds = array<i64: 48, 128>}, {transform_indices = @transform_1, window_bounds = array<i64: 48, 128>}, {transform_indices = @transform_2, window_bounds = array<i64: 1, 1>}]} {
    %c0 = arith.constant 0 : index
    %c0_0 = arith.constant 0 : index
    %0 = vector.load %arg1[%c0, %c0_0] : memref<48x128xf32, #tpu.memory_space<vmem>>, vector<48x128xf32>
    %c0_1 = arith.constant 0 : index
    %c0_2 = arith.constant 0 : index
    %1 = vector.load %arg2[%c0_1, %c0_2] : memref<48x128xf32, #tpu.memory_space<vmem>>, vector<48x128xf32>
    %2 = tpu.iota {dimensions = array<i32: 0>} : vector<48x1xi32>
    %3 = arith.sitofp %2 : vector<48x1xi32> to vector<48x1xf32>
    %cst = arith.constant 1.600000e+01 : f32
    %4 = vector.broadcast %cst : f32 to vector<48x1xf32>
    %5 = arith.divf %3, %4 : vector<48x1xf32>
    %6 = math.floor %5 : vector<48x1xf32>
    %cst_3 = arith.constant 1.600000e+01 : f32
    %7 = vector.broadcast %cst_3 : f32 to vector<48x1xf32>
    %8 = arith.mulf %6, %7 : vector<48x1xf32>
    %9 = arith.subf %3, %8 : vector<48x1xf32>
    %cst_4 = arith.constant 5.000000e-01 : f32
    %10 = vector.broadcast %cst_4 : f32 to vector<48x1xf32>
    %11 = arith.cmpf olt, %9, %10 : vector<48x1xf32>
    %cst_5 = arith.constant 1.450000e+01 : f32
    %12 = vector.broadcast %cst_5 : f32 to vector<48x1xf32>
    %13 = arith.cmpf ogt, %9, %12 : vector<48x1xf32>
    %14 = tpu.iota {dimensions = array<i32: 1>} : vector<1x128xi32>
    %c0_i32 = arith.constant 0 : i32
    %15 = vector.broadcast %c0_i32 : i32 to vector<1x128xi32>
    %16 = arith.cmpi eq, %14, %15 : vector<1x128xi32>
    %c127_i32 = arith.constant 127 : i32
    %17 = vector.broadcast %c127_i32 : i32 to vector<1x128xi32>
    %18 = arith.cmpi eq, %14, %17 : vector<1x128xi32>
    %c1_i32 = arith.constant 1 : i32
    %19 = tpu.dynamic_rotate %0 by %c1_i32 dim 0 : vector<48x128xf32>, i32 -> vector<48x128xf32>
    %cst_6 = arith.constant 0.000000e+00 : f32
    %20 = vector.shape_cast %11 : vector<48x1xi1> to vector<48x1xi1>
    %21 = vector.broadcast %20 : vector<48x1xi1> to vector<48x128xi1>
    %22 = vector.broadcast %cst_6 : f32 to vector<48x128xf32>
    %23 = arith.select %21, %22, %19 : vector<48x128xi1>, vector<48x128xf32>
    %c47_i32 = arith.constant 47 : i32
    %24 = tpu.dynamic_rotate %0 by %c47_i32 dim 0 : vector<48x128xf32>, i32 -> vector<48x128xf32>
    %cst_7 = arith.constant 0.000000e+00 : f32
    %25 = vector.shape_cast %13 : vector<48x1xi1> to vector<48x1xi1>
    %26 = vector.broadcast %25 : vector<48x1xi1> to vector<48x128xi1>
    %27 = vector.broadcast %cst_7 : f32 to vector<48x128xf32>
    %28 = arith.select %26, %27, %24 : vector<48x128xi1>, vector<48x128xf32>
    %cst_8 = arith.constant 2.000000e+00 : f32
    %29 = vector.broadcast %cst_8 : f32 to vector<48x128xf32>
    %30 = arith.mulf %29, %0 : vector<48x128xf32>
    %31 = arith.addf %23, %30 : vector<48x128xf32>
    %32 = arith.addf %31, %28 : vector<48x128xf32>
    %33 = arith.subf %23, %28 : vector<48x128xf32>
    %c1_i32_9 = arith.constant 1 : i32
    %34 = tpu.dynamic_rotate %32 by %c1_i32_9 dim 1 : vector<48x128xf32>, i32 -> vector<48x128xf32>
    %cst_10 = arith.constant 0.000000e+00 : f32
    %35 = vector.shape_cast %16 : vector<1x128xi1> to vector<1x128xi1>
    %36 = vector.broadcast %35 : vector<1x128xi1> to vector<48x128xi1>
    %37 = vector.broadcast %cst_10 : f32 to vector<48x128xf32>
    %38 = arith.select %36, %37, %34 : vector<48x128xi1>, vector<48x128xf32>
    %c127_i32_11 = arith.constant 127 : i32
    %39 = tpu.dynamic_rotate %32 by %c127_i32_11 dim 1 : vector<48x128xf32>, i32 -> vector<48x128xf32>
    %cst_12 = arith.constant 0.000000e+00 : f32
    %40 = vector.shape_cast %18 : vector<1x128xi1> to vector<1x128xi1>
    %41 = vector.broadcast %40 : vector<1x128xi1> to vector<48x128xi1>
    %42 = vector.broadcast %cst_12 : f32 to vector<48x128xf32>
    %43 = arith.select %41, %42, %39 : vector<48x128xi1>, vector<48x128xf32>
    %c1_i32_13 = arith.constant 1 : i32
    %44 = tpu.dynamic_rotate %33 by %c1_i32_13 dim 1 : vector<48x128xf32>, i32 -> vector<48x128xf32>
    %cst_14 = arith.constant 0.000000e+00 : f32
    %45 = vector.shape_cast %16 : vector<1x128xi1> to vector<1x128xi1>
    %46 = vector.broadcast %45 : vector<1x128xi1> to vector<48x128xi1>
    %47 = vector.broadcast %cst_14 : f32 to vector<48x128xf32>
    %48 = arith.select %46, %47, %44 : vector<48x128xi1>, vector<48x128xf32>
    %c127_i32_15 = arith.constant 127 : i32
    %49 = tpu.dynamic_rotate %33 by %c127_i32_15 dim 1 : vector<48x128xf32>, i32 -> vector<48x128xf32>
    %cst_16 = arith.constant 0.000000e+00 : f32
    %50 = vector.shape_cast %18 : vector<1x128xi1> to vector<1x128xi1>
    %51 = vector.broadcast %50 : vector<1x128xi1> to vector<48x128xi1>
    %52 = vector.broadcast %cst_16 : f32 to vector<48x128xf32>
    %53 = arith.select %51, %52, %49 : vector<48x128xi1>, vector<48x128xf32>
    %54 = arith.subf %38, %43 : vector<48x128xf32>
    %cst_17 = arith.constant 2.000000e+00 : f32
    %55 = vector.broadcast %cst_17 : f32 to vector<48x128xf32>
    %56 = arith.mulf %55, %33 : vector<48x128xf32>
    %57 = arith.addf %48, %56 : vector<48x128xf32>
    %58 = arith.addf %57, %53 : vector<48x128xf32>
    %59 = math.absf %54 : vector<48x128xf32>
    %60 = math.absf %58 : vector<48x128xf32>
    %61 = arith.addf %59, %60 : vector<48x128xf32>
    %cst_18 = arith.constant 1.000000e+00 : f32
    %62 = vector.broadcast %cst_18 : f32 to vector<48x128xf32>
    %63 = arith.subf %62, %1 : vector<48x128xf32>
    %64 = arith.mulf %61, %63 : vector<48x128xf32>
    %65 = vector.shape_cast %64 : vector<48x128xf32> to vector<1x48x128xf32>
    %cst_19 = arith.constant dense<0.000000e+00> : vector<1xf32>
    %66 = vector.multi_reduction <add>, %65, %cst_19 [1, 2] : vector<1x48x128xf32> to vector<1xf32>
    %67 = vector.shape_cast %66 : vector<1xf32> to vector<1x1x1xf32>
    %68 = vector.extract %67[0, 0, 0] : f32 from vector<1x1x1xf32>
    %c0_20 = arith.constant 0 : index
    %c0_21 = arith.constant 0 : index
    %69 = memref.load %arg3[%c0_20, %c0_21] : memref<1x1xf32, #tpu.memory_space<smem>>
    memref.store %68, %arg3[%c0_20, %c0_21] : memref<1x1xf32, #tpu.memory_space<smem>>
    return
  }
  func.func @transform_0(%arg0: i32) -> (i32, i32) {
    %c0_i32 = arith.constant 0 : i32
    %c0_i32_0 = arith.constant 0 : i32
    return %arg0, %c0_i32 : i32, i32
  }
  func.func @transform_1(%arg0: i32) -> (i32, i32) {
    %c0_i32 = arith.constant 0 : i32
    %c0_i32_0 = arith.constant 0 : i32
    return %arg0, %c0_i32 : i32, i32
  }
  func.func @transform_2(%arg0: i32) -> (i32, i32) {
    %c0_i32 = arith.constant 0 : i32
    %c0_i32_0 = arith.constant 0 : i32
    return %arg0, %c0_i32 : i32, i32
  }
}

</mosaic_0001>

<bundles_post_ra>
// kernel: boundary_loss.1
= control target key start
LH: loop header
LB: loop body
LE: loop exit
PB: predicated region body
PF: predicated region fallthrough
CT: control target
= control target key end

     0   :  { %7 = vsyncpa [#allocation3], 0  ;;  %s674_s0 = inlined_call_operand.hbm [shape: f32[48,128], index: 0, kind: input, shape index: {}]   ;;  %s675_s1 = inlined_call_operand.hbm [shape: f32[48,128], index: 1, kind: input, shape index: {}]   ;;  %s676_s2 = inlined_call_operand.hbm [shape: f32[1,1], index: 2, kind: output, shape index: {}]  }
   0x1   :  { %8 = vsyncpa [#allocation6], 0 }
   0x2   :  { %9 = vsyncpa [#allocation4], 0  ;;  %s422_s9 = smov [#allocation2]   ;;  %s362_s13 = scalar_lea.hbm %s674_s0, 768 }
   0x3   :  { %s15_s10 = sshll.u32 %s422_s9, 4  ;;  %p363_p0 = scmp.ne.s32.totalorder %s674_s0, %s362_s13  ;;  %s16_s10 = int_to_ptr.vmem [resolvable:$true] %s15_s10 }
   0x4   :  { %p366_p1 = scmp.lt.u32.totalorder %s362_s13, %s674_s0 }
   0x6   :  { %p368_p2 = pnand %p366_p1, %p363_p0 }
   0x8   :  { %371 = shalt.err (!%p368_p2)
}
   0x9   :  { %s372_s18 = scalar_lea.vmem %s16_s10, 768  ;;  %p377_p4 = scmp.lt.s32.totalorder %s16_s10, %s16_s10 }
   0xa   :  { %p373_p3 = scmp.ne.s32.totalorder %s16_s10, %s372_s18  ;;  %p378_p5 = scmp.lt.s32.totalorder %s372_s18, %s372_s18 }
   0xc   :  { %p379_p6 = por %p378_p5, %p377_p4 }
   0xe   :  { %p380_p7 = pnand %p379_p6, %p373_p3 }
  0x10   :  { %383 = shalt.err (!%p380_p7)
}
  0x11   :  { %s423_s19 = smov 128   ;;  %s424_s20 = smov 8  }
  0x12   :  { %21 = dma.hbm_to_vmem [thread:$0]  %s674_s0, 768, %s16_s10, [#allocation3], %s423_s19, %s423_s19, %s424_s20  }
  0x13   :  { %s425_s23 = smov [#allocation5]   ;;  %s384_s27 = scalar_lea.hbm %s675_s1, 768 }
  0x14   :  { %s27_s24 = sshll.u32 %s425_s23, 4  ;;  %p385_p8 = scmp.ne.s32.totalorder %s675_s1, %s384_s27  ;;  %s28_s24 = int_to_ptr.vmem [resolvable:$true] %s27_s24 }
  0x15   :  { %p388_p9 = scmp.lt.u32.totalorder %s384_s27, %s675_s1 }
  0x17   :  { %p390_p10 = pnand %p388_p9, %p385_p8 }
  0x19   :  { %393 = shalt.err (!%p390_p10)
}
  0x1a   :  { %s394_s4 = scalar_lea.vmem %s28_s24, 768  ;;  %p399_p12 = scmp.lt.s32.totalorder %s28_s24, %s28_s24 }
  0x1b   :  { %p395_p11 = scmp.ne.s32.totalorder %s28_s24, %s394_s4  ;;  %p400_p13 = scmp.lt.s32.totalorder %s394_s4, %s394_s4 }
  0x1d   :  { %p401_p0 = por %p400_p13, %p399_p12 }
  0x1f   :  { %p402_p1 = pnand %p401_p0, %p395_p11 }
  0x21   :  { %405 = shalt.err (!%p402_p1)
}
  0x22   :  { %33 = dma.hbm_to_vmem [thread:$0]  %s675_s1, 768, %s28_s24, [#allocation6], %s423_s19, %s423_s19, %s424_s20  }
  0x23   :  { %416 = dma.done.wait [#allocation3], 768  }
  0x24   :  { %417 = vsyncadd [#allocation3], 4294966528 }
  0x25   :  { %418 = dma.done.wait [#allocation6], 768  }
  0x26   :  { %419 = vsyncadd [#allocation6], 4294966528  ;;  %v52_v0 = vlaneseq  ;;  %v477_v8 = vld [vmem:[#allocation2] sm:$0xff]  ;;  %v479_v9 = vld [vmem:[#allocation2 + $0x8] sm:$0xff]  ;;  %s426_s1 = smov 127   ;;  %s427_s6 = smov 1  }
  0x27   :  { %v481_v10 = vld [vmem:[#allocation2 + $0x28] sm:$0xff]  ;;  %v106_v14 = vrot.slane %v477_v8, 7  ;;  %v137_v16 = vrot.slane %v477_v8, 1  ;;  %v491_v17 = vld [vmem:[#allocation2 + $0x10] sm:$0xff]  ;;  %v138_v18 = vrot.slane %v479_v9, 1  ;;  %v107_v20 = vrot.slane %v479_v9, 7 }
  0x28   :  { %v469_v1 = vshrl.u32 %v52_v0, 7  ;;  %v111_v15 = vrot.slane %v481_v10, 7  ;;  %v495_v21 = vld [vmem:[#allocation2 + $0x18] sm:$0xff]  ;;  %v168_v24 = vmul.f32 2.0, %v477_v8  ;;  %v139_v25 = vrot.slane %v491_v17, 1  ;;  %v500_v26 = vld [vmem:[#allocation2 + $0x20] sm:$0xff] }
  0x29   :  { %v108_v31 = vrot.slane %v491_v17, 7  ;;  %v109_v35 = vrot.slane %v495_v21, 7  ;;  %v140_v37 = vrot.slane %v495_v21, 1  ;;  %v141_v38 = vrot.slane %v500_v26, 1  ;;  %s406_s10 = scalar_lea.hbm %s676_s2, 16 }
  0x2a   :  { %v59_v2 = vcvt.s32.f32 %v469_v1  ;;  %v54_v3 = vadd.s32 8, %v469_v1  ;;  %v56_v4 = vadd.s32 24, %v469_v1  ;;  %v475_v5 = vadd.s32 16, %v469_v1  ;;  %p407_p2 = scmp.ne.s32.totalorder %s676_s2, %s406_s10  ;;  %p410_p3 = scmp.lt.u32.totalorder %s406_s10, %s676_s2 }
  0x2b   :  { %vm112_vm0 = vcmp.lt.s32.totalorder %v469_v1, 1  ;;  %vm143_vm1 = vcmp.lt.s32.totalorder %v469_v1, 7  ;;  %v486_v12 = vadd.s32 32, %v469_v1  ;;  %v169_v59 = vmul.f32 2.0, %v479_v9 }
  0x2c   :  { %v66_v6 = vmul.f32 0.0625, %v59_v2  ;;  %v60_v7 = vcvt.s32.f32 %v54_v3  ;;  %v62_v11 = vcvt.s32.f32 %v56_v4  ;;  %v61_v22 = vcvt.s32.f32 %v475_v5  ;;  %p412_p4 = pnand %p410_p3, %p407_p2 }
  0x2d   :  { %v118_v28 = vsel %vm112_vm0, %v111_v15, %v106_v14  ;;  %v148_v29 = vsel %vm143_vm1, %v137_v16, %v138_v18  ;;  %v117_v33 = vsel %vm112_vm0, %v106_v14, %v107_v20  ;;  %v147_v40 = vsel %vm143_vm1, %v138_v18, %v139_v25 }
  0x2e   :  { %v72_v13 = vfloor.f32 %v66_v6  ;;  %v67_v19 = vmul.f32 0.0625, %v60_v7  ;;  %v69_v27 = vmul.f32 0.0625, %v62_v11  ;;  %v68_v39 = vmul.f32 0.0625, %v61_v22 }
  0x2f   :  { %v115_v45 = vsel %vm112_vm0, %v108_v31, %v109_v35  ;;  %v145_v50 = vsel %vm143_vm1, %v140_v37, %v141_v38  ;;  %v63_v51 = vcvt.s32.f32 %v486_v12  ;;  %v58_v60 = vadd.s32 40, %v469_v1 }
  0x30   :  { %v78_v23 = vmul.f32 16.0, %v72_v13  ;;  %v73_v30 = vfloor.f32 %v67_v19  ;;  %v75_v34 = vfloor.f32 %v69_v27  ;;  %v74_v49 = vfloor.f32 %v68_v39 }
  0x31   :  { %v116_v62 = vsel %vm112_vm0, %v107_v20, %v108_v31  ;;  %v146_v63 = vsel %vm143_vm1, %v139_v25, %v140_v37  ;;  %v64_v9 = vcvt.s32.f32 %v58_v60  ;;  %v170_v13 = vmul.f32 2.0, %v491_v17 }
  0x32   :  { %v84_v32 = vsub.f32 %v59_v2, %v78_v23  ;;  %v79_v36 = vmul.f32 16.0, %v73_v30  ;;  %v81_v41 = vmul.f32 16.0, %v75_v34  ;;  %v80_v57 = vmul.f32 16.0, %v74_v49 }
  0x33   :  { %v70_v2 = vmul.f32 0.0625, %v63_v51  ;;  %v71_v18 = vmul.f32 0.0625, %v64_v9  ;;  %v171_v20 = vmul.f32 2.0, %v495_v21  ;;  %v173_v39 = vmul.f32 2.0, %v481_v10 }
  0x34   :  { %vm90_vm2 = vcmp.lt.f32.partialorder %v84_v32, 0.5  ;;  %vm96_vm3 = vcmp.gt.f32.partialorder %v84_v32, 14.5  ;;  %v85_v44 = vsub.f32 %v60_v7, %v79_v36  ;;  %v87_v48 = vsub.f32 %v62_v11, %v81_v41 }
  0x35   :  { %v131_v42 = vsel %vm90_vm2, 0.0, %v118_v28  ;;  %v162_v43 = vsel %vm96_vm3, 0.0, %v148_v29  ;;  %v86_v61 = vsub.f32 %v61_v22, %v80_v57  ;;  %v76_v7 = vfloor.f32 %v70_v2 }
  0x36   :  { %v522_v46 = vsub.f32 %v131_v42, %v162_v43  ;;  %v174_v47 = vadd.f32 %v168_v24, %v131_v42  ;;  %vm91_vm4 = vcmp.lt.f32.partialorder %v85_v44, 0.5  ;;  %vm97_vm5 = vcmp.gt.f32.partialorder %v85_v44, 14.5 }
  0x37   :  { %v132_v53 = vsel %vm91_vm4, 0.0, %v117_v33  ;;  %v163_v54 = vsel %vm97_vm5, 0.0, %v147_v40  ;;  %vm93_vm6 = vcmp.lt.f32.partialorder %v87_v48, 0.5  ;;  %vm99_vm7 = vcmp.gt.f32.partialorder %v87_v48, 14.5 }
  0x38   :  { %250 = vrot.lane.b32.xlu1 %v522_v46, %s426_s1  ;;  %232 = vrot.lane.b32.xlu0 %v522_v46, %s427_s6  ;;  %v180_v52 = vadd.f32 %v174_v47, %v162_v43  ;;  %v533_v55 = vsub.f32 %v132_v53, %v163_v54  ;;  %v134_v56 = vsel %vm93_vm6, 0.0, %v115_v45  ;;  %v165_v58 = vsel %vm99_vm7, 0.0, %v145_v50 }
  0x39   :  { %v544_v3 = vsub.f32 %v134_v56, %v165_v58  ;;  %v175_v4 = vadd.f32 %v169_v59, %v132_v53  ;;  %vm92_vm8 = vcmp.lt.f32.partialorder %v86_v61, 0.5  ;;  %vm98_vm9 = vcmp.gt.f32.partialorder %v86_v61, 14.5 }
  0x3a   :  { %v133_v5 = vsel %vm92_vm8, 0.0, %v116_v62  ;;  %v164_v6 = vsel %vm98_vm9, 0.0, %v146_v63  ;;  %v82_v14 = vmul.f32 16.0, %v76_v7  ;;  %v110_v22 = vrot.slane %v500_v26, 7 }
  0x3b   :  { %v549_v11 = vsub.f32 %v133_v5, %v164_v6  ;;  %v181_v12 = vadd.f32 %v175_v4, %v163_v54  ;;  %v176_v19 = vadd.f32 %v170_v13, %v133_v5  ;;  %v142_v24 = vrot.slane %v481_v10, 1 }
  0x3c   :  { %192 = vrot.lane.b32.xlu1 %v180_v52, %s427_s6  ;;  %234 = vrot.lane.b32.xlu0 %v533_v55, %s427_s6  ;;  %v88_v23 = vsub.f32 %v63_v51, %v82_v14  ;;  %v77_v25 = vfloor.f32 %v71_v18  ;;  %v177_v27 = vadd.f32 %v171_v20, %v134_v56  ;;  %v114_v28 = vsel %vm112_vm0, %v109_v35, %v110_v22  ;;  %v47_v14 = vld [vmem:[#allocation5 + $0x8] sm:$0xff] }
  0x3d   :  { %v182_v17 = vadd.f32 %v176_v19, %v164_v6  ;;  %v144_v29 = vsel %vm143_vm1, %v141_v38, %v142_v24  ;;  %v172_v32 = vmul.f32 2.0, %v500_v26  ;;  %v113_v37 = vsel %vm112_vm0, %v110_v22, %v111_v15 }
  0x3e   :  { %vm94_vm10 = vcmp.lt.f32.partialorder %v88_v23, 0.5  ;;  %vm100_vm11 = vcmp.gt.f32.partialorder %v88_v23, 14.5  ;;  %v83_v30 = vmul.f32 16.0, %v77_v25  ;;  %v183_v31 = vadd.f32 %v177_v27, %v165_v58 }
  0x3f   :  { %v135_v33 = vsel %vm94_vm10, 0.0, %v114_v28  ;;  %v166_v21 = vsel %vm100_vm11, 0.0, %v144_v29  ;;  %v149_v26 = vsel %vm143_vm1, %v142_v24, %v137_v16  ;;  %v604_v10 = vand.u32 127, %v52_v0 }
  0x40   :  { %238 = vrot.lane.b32.xlu1 %v544_v3, %s427_s6  ;;  %212 = vrot.lane.b32.xlu0 %v180_v52, %s426_s1  ;;  %v89_v34 = vsub.f32 %v64_v9, %v83_v30  ;;  %v575_v35 = vsub.f32 %v135_v33, %v166_v21  ;;  %v178_v36 = vadd.f32 %v172_v32, %v135_v33  ;;  %v274_v16 = vmul.f32 2.0, %v522_v46  ;;  %v46_v9 = vld [vmem:[#allocation5] sm:$0xff] }
  0x41   :  { %vm104_vm14 = vcmp.eq.s32.totalorder %v604_v10, 0  ;;  %vm105_vm15 = vcmp.eq.s32.totalorder %v604_v10, 127  ;;  %v275_v47 = vmul.f32 2.0, %v533_v55  ;;  %v277_v52 = vmul.f32 2.0, %v544_v3 }
  0x42   :  { %vm95_vm12 = vcmp.lt.f32.partialorder %v89_v34, 0.5  ;;  %vm101_vm13 = vcmp.gt.f32.partialorder %v89_v34, 14.5  ;;  %v184_v38 = vadd.f32 %v178_v36, %v166_v21  ;;  %v276_v60 = vmul.f32 2.0, %v549_v11  ;;  %v48_v34 = vld [vmem:[#allocation5 + $0x10] sm:$0xff] }
  0x43   :  { %v136_v40 = vsel %vm95_vm12, 0.0, %v113_v37  ;;  %v167_v41 = vsel %vm101_vm13, 0.0, %v149_v26  ;;  %v310_v20 = vsub.f32 1.0, %v46_v9  ;;  %v311_v23 = vsub.f32 1.0, %v47_v14 }
  0x44   :  { %236 = vrot.lane.b32.xlu0 %v549_v11, %s427_s6  ;;  %194 = vrot.lane.b32.xlu1 %v181_v12, %s427_s6  ;;  %v592_v15 = vsub.f32 %v136_v40, %v167_v41  ;;  %v179_v8 = vadd.f32 %v173_v39, %v136_v40  ;;  %v312_v40 = vsub.f32 1.0, %v48_v34 }
  0x46   :  { %v185_v1 = vadd.f32 %v179_v8, %v167_v41 }
  0x48   :  { %252 = vrot.lane.b32.xlu0 %v533_v55, %s426_s1  ;;  %214 = vrot.lane.b32.xlu1 %v181_v12, %s426_s1 }
  0x4c   :  { %216 = vrot.lane.b32.xlu0 %v182_v17, %s426_s1  ;;  %196 = vrot.lane.b32.xlu1 %v182_v17, %s427_s6 }
  0x50   :  { %254 = vrot.lane.b32.xlu0 %v549_v11, %s426_s1  ;;  %198 = vrot.lane.b32.xlu1 %v183_v31, %s427_s6 }
  0x54   :  { %218 = vrot.lane.b32.xlu0 %v183_v31, %s426_s1  ;;  %240 = vrot.lane.b32.xlu1 %v575_v35, %s427_s6 }
  0x58   :  { %256 = vrot.lane.b32.xlu0 %v544_v3, %s426_s1  ;;  %200 = vrot.lane.b32.xlu1 %v184_v38, %s427_s6 }
  0x5c   :  { %220 = vrot.lane.b32.xlu0 %v184_v38, %s426_s1  ;;  %242 = vrot.lane.b32.xlu1 %v592_v15, %s427_s6  ;;  %v278_v38 = vmul.f32 2.0, %v575_v35 }
  0x60   :  { %258 = vrot.lane.b32.xlu0 %v575_v35, %s426_s1  ;;  %202 = vrot.lane.b32.xlu1 %v185_v1, %s427_s6 }
  0x64   :  { %222 = vrot.lane.b32.xlu0 %v185_v1, %s426_s1  ;;  %260 = vrot.lane.b32.xlu1 %v592_v15, %s426_s1 }
  0xaa   :  { %v251_v42 = vpop.permute.xlu1 %250  ;;  %v233_v43 = vpop.permute.xlu0 %232 }
  0xab   :  { %v244_v44 = vsel %vm104_vm14, 0.0, %v233_v43  ;;  %v262_v48 = vsel %vm105_vm15, 0.0, %v251_v42 }
  0xac   :  { %v280_v45 = vadd.f32 %v274_v16, %v244_v44 }
  0xae   :  { %v286_v49 = vadd.f32 %v280_v45, %v262_v48  ;;  %v193_v0 = vpop.permute.xlu1 %192  ;;  %v235_v50 = vpop.permute.xlu0 %234 }
  0xaf   :  { %v245_v51 = vsel %vm104_vm14, 0.0, %v235_v50  ;;  %v206_v56 = vsel %vm104_vm14, 0.0, %v193_v0  ;;  %v49_v0 = vld [vmem:[#allocation5 + $0x18] sm:$0xff] }
  0xb0   :  { %v281_v46 = vadd.f32 %v275_v47, %v245_v51  ;;  %v298_v61 = vand.u32 2147483647, %v286_v49 }
  0xb2   :  { %v239_v53 = vpop.permute.xlu1 %238  ;;  %v213_v54 = vpop.permute.xlu0 %212 }
  0xb3   :  { %v247_v55 = vsel %vm104_vm14, 0.0, %v239_v53  ;;  %v226_v57 = vsel %vm105_vm15, 0.0, %v213_v54  ;;  %v313_v54 = vsub.f32 1.0, %v49_v0 }
  0xb4   :  { %v283_v58 = vadd.f32 %v277_v52, %v247_v55  ;;  %v268_v59 = vsub.f32 %v206_v56, %v226_v57 }
  0xb6   :  { %v292_v62 = vand.u32 2147483647, %v268_v59  ;;  %v237_v63 = vpop.permute.xlu0 %236  ;;  %v195_v2 = vpop.permute.xlu1 %194 }
  0xb7   :  { %v246_v3 = vsel %vm104_vm14, 0.0, %v237_v63  ;;  %v207_v12 = vsel %vm104_vm14, 0.0, %v195_v2 }
  0xb8   :  { %v304_v4 = vadd.f32 %v298_v61, %v292_v62  ;;  %v282_v5 = vadd.f32 %v276_v60, %v246_v3 }
  0xba   :  { %v253_v6 = vpop.permute.xlu0 %252  ;;  %v215_v7 = vpop.permute.xlu1 %214  ;;  %v316_v30 = vmul.f32 %v310_v20, %v304_v4 }
  0xbb   :  { %v263_v13 = vsel %vm105_vm15, 0.0, %v253_v6  ;;  %v227_v11 = vsel %vm105_vm15, 0.0, %v215_v7 }
  0xbc   :  { %v287_v18 = vadd.f32 %v281_v46, %v263_v13  ;;  %v269_v19 = vsub.f32 %v207_v12, %v227_v11  ;;  %v279_v46 = vmul.f32 2.0, %v592_v15 }
  0xbe   :  { %v299_v22 = vand.u32 2147483647, %v287_v18  ;;  %v293_v24 = vand.u32 2147483647, %v269_v19  ;;  %v217_v25 = vpop.permute.xlu0 %216  ;;  %v197_v17 = vpop.permute.xlu1 %196 }
  0xbf   :  { %v228_v27 = vsel %vm105_vm15, 0.0, %v217_v25  ;;  %v208_v28 = vsel %vm104_vm14, 0.0, %v197_v17 }
  0xc0   :  { %v305_v29 = vadd.f32 %v299_v22, %v293_v24  ;;  %v270_v32 = vsub.f32 %v208_v28, %v228_v27  ;;  %v51_v22 = vld [vmem:[#allocation5 + $0x28] sm:$0xff] }
  0xc1   :  { %v315_v28 = vsub.f32 1.0, %v51_v22 }
  0xc2   :  { %v317_v31 = vmul.f32 %v311_v23, %v305_v29  ;;  %v255_v33 = vpop.permute.xlu0 %254  ;;  %v199_v21 = vpop.permute.xlu1 %198  ;;  %v294_v39 = vand.u32 2147483647, %v270_v32 }
  0xc3   :  { %v264_v36 = vsel %vm105_vm15, 0.0, %v255_v33  ;;  %v209_v45 = vsel %vm104_vm14, 0.0, %v199_v21 }
  0xc4   :  { %v322_v37 = vadd.f32 %v317_v31, %v316_v30  ;;  %v288_v26 = vadd.f32 %v282_v5, %v264_v36  ;;  %v50_v5 = vld [vmem:[#allocation5 + $0x20] sm:$0xff] }
  0xc5   :  { %v314_v11 = vsub.f32 1.0, %v50_v5 }
  0xc6   :  { %v300_v41 = vand.u32 2147483647, %v288_v26  ;;  %v219_v8 = vpop.permute.xlu0 %218  ;;  %v241_v1 = vpop.permute.xlu1 %240 }
  0xc7   :  { %v229_v16 = vsel %vm105_vm15, 0.0, %v219_v8  ;;  %v248_v42 = vsel %vm104_vm14, 0.0, %v241_v1 }
  0xc8   :  { %v306_v43 = vadd.f32 %v300_v41, %v294_v39  ;;  %v284_v44 = vadd.f32 %v278_v38, %v248_v42  ;;  %v271_v48 = vsub.f32 %v209_v45, %v229_v16 }
  0xca   :  { %v318_v47 = vmul.f32 %v312_v40, %v306_v43  ;;  %v257_v49 = vpop.permute.xlu0 %256  ;;  %v201_v35 = vpop.permute.xlu1 %200  ;;  %v295_v53 = vand.u32 2147483647, %v271_v48 }
  0xcb   :  { %v265_v50 = vsel %vm105_vm15, 0.0, %v257_v49  ;;  %v210_v63 = vsel %vm104_vm14, 0.0, %v201_v35 }
  0xcc   :  { %v289_v51 = vadd.f32 %v283_v58, %v265_v50  ;;  %v323_v52 = vadd.f32 %v322_v37, %v318_v47 }
  0xce   :  { %v301_v56 = vand.u32 2147483647, %v289_v51  ;;  %v221_v55 = vpop.permute.xlu0 %220  ;;  %v243_v57 = vpop.permute.xlu1 %242 }
  0xcf   :  { %v230_v59 = vsel %vm105_vm15, 0.0, %v221_v55  ;;  %v249_v60 = vsel %vm104_vm14, 0.0, %v243_v57 }
  0xd0   :  { %v307_v61 = vadd.f32 %v301_v56, %v295_v53  ;;  %v285_v62 = vadd.f32 %v279_v46, %v249_v60  ;;  %v272_v2 = vsub.f32 %v210_v63, %v230_v59 }
  0xd2   :  { %v319_v58 = vmul.f32 %v313_v54, %v307_v61  ;;  %v259_v15 = vpop.permute.xlu0 %258  ;;  %v203_v3 = vpop.permute.xlu1 %202  ;;  %v296_v9 = vand.u32 2147483647, %v272_v2 }
  0xd3   :  { %v266_v4 = vsel %vm105_vm15, 0.0, %v259_v15  ;;  %v211_v18 = vsel %vm104_vm14, 0.0, %v203_v3 }
  0xd4   :  { %v290_v6 = vadd.f32 %v284_v44, %v266_v4  ;;  %v324_v7 = vadd.f32 %v323_v52, %v319_v58 }
  0xd6   :  { %v302_v12 = vand.u32 2147483647, %v290_v6  ;;  %v223_v13 = vpop.permute.xlu0 %222  ;;  %v261_v14 = vpop.permute.xlu1 %260 }
  0xd7   :  { %v231_v19 = vsel %vm105_vm15, 0.0, %v223_v13  ;;  %v267_v20 = vsel %vm105_vm15, 0.0, %v261_v14 }
  0xd8   :  { %v308_v23 = vadd.f32 %v302_v12, %v296_v9  ;;  %v273_v24 = vsub.f32 %v211_v18, %v231_v19  ;;  %v291_v25 = vadd.f32 %v285_v62, %v267_v20 }
  0xda   :  { %v297_v17 = vand.u32 2147483647, %v273_v24  ;;  %v303_v27 = vand.u32 2147483647, %v291_v25  ;;  %v320_v29 = vmul.f32 %v314_v11, %v308_v23 }
  0xdc   :  { %v309_v30 = vadd.f32 %v303_v27, %v297_v17  ;;  %v325_v31 = vadd.f32 %v324_v7, %v320_v29 }
  0xde   :  { %v321_v32 = vmul.f32 %v315_v28, %v309_v30 }
  0xe0   :  { %v326_v33 = vadd.f32 %v325_v31, %v321_v32 }
  0xe2   :  { %327 = vadd.xlane.f32.xlu0 %v326_v33 }
 0x16f   :  { %v328_v21 = vpop.xlane.xlu0 %327 }
 0x170   :  { %v329_v34 = vrot.slane %v328_v21, 4 }
 0x172   :  { %v330_v36 = vadd.f32 %v329_v34, %v328_v21 }
 0x174   :  { %v331_v37 = vrot.slane %v330_v36, 2 }
 0x176   :  { %v332_v26 = vadd.f32 %v331_v37, %v330_v36 }
 0x178   :  { %v333_v10 = vrot.slane %v332_v26, 1 }
 0x17a   :  { %v334_v38 = vadd.f32 %v333_v10, %v332_v26 }
 0x17c   :  { %353 = vpush %v334_v38 }
 0x1ad   :  { %s354_s7 = spop %353 }
 0x1ae   :  { %337 = sst [smem:[#allocation7]] %s354_s7 }
 0x1af   :  { %415 = shalt.err (!%p412_p4)
}
 0x1b0   :  { %s428_s15 = smov [#allocation7]  }
 0x1b1   :  { %345 = dma.smem_to_hbm %s428_s15, 16, %s676_s2, [#allocation4]  }
 0x1b2   :  { %420 = dma.done.wait [#allocation4], 16  }
 0x1b3   :  { %421 = vsyncadd [#allocation4], 4294967280 }
 0x1b4   :  { %349 = sfence }
 0x1b5   :  { %350 = vsyncpa [#allocation3], 1 }
 0x1b6   :  { %351 = vsyncpa [#allocation6], 1 }
 0x1b7   :  { %352 = vsyncpa [#allocation4], 1 }

</bundles_post_ra>
